<compile_context>
chip_gen: v7x
topology: tpu7x:2x2x1
jax: 0.10.0
libtpu: 0.0.40
codegen_flags: <defaults>
</compile_context>

<pallas_src>
import jax
import jax.numpy as jnp
from jax.experimental import pallas as pl
from jax.experimental.pallas import tpu as pltpu


# ----------------------------- kernel body -----------------------------------


def _nan_embed_kernel(x_ref, w_ref, b_ref, o_ref):
    x = x_ref[...]                                        # [TN, in]
    nan_mask = jnp.isnan(x)
    big = jnp.finfo(x.dtype).max
    # torch.nan_to_num defaults: NaN -> 0, +inf -> finfo.max, -inf -> finfo.min.
    xc = jnp.clip(jnp.where(nan_mask, 0.0, x), -big, big)
    valid = jnp.where(nan_mask, 0.0, 1.0).astype(jnp.float32)

    # Masked matmul on the MXU: [TN, in] @ [in, out_pad] (W already holds 1/in).
    # TODO(synk): for in_size <= ~16 an unrolled VPU rank-1 accumulate could replace
    # this 97%-idle MXU pass; measure-first — the kernel is HBM-write-bound, not MXU-bound.
    acc = jnp.dot(xc, w_ref[...], preferred_element_type=jnp.float32)

    # Masked bias contribution on VPU + XLU lane-reduce (not a width-1 MXU pass):
    #   sum_i valid[., i] * (bias[i]/in)  ->  [TN, 1], broadcast over out lanes.
    bias_sum = jnp.sum(valid * b_ref[...], axis=-1, keepdims=True)

    o_ref[...] = (acc + bias_sum).astype(o_ref.dtype)


# ----------------------------- helpers ----------------------------------------


def _round_up(n, m):
    return ((n + m - 1) // m) * m


def _lane_bytes(d):
    # Elements in a VMEM row are laid out in 128-lane tiles.
    return _round_up(max(d, 128), 128) * 4


def _vmem_estimate(tile_n, in_size, out_pad, *, w_buffers=2):
    x_buf = 2 * tile_n * _lane_bytes(in_size)                      # x tile, double-buffered
    o_buf = 2 * tile_n * _lane_bytes(out_pad)                      # out tile, double-buffered
    w_buf = w_buffers * _round_up(in_size, 8) * _lane_bytes(out_pad)  # resident W
    b_buf = 2 * 8 * _lane_bytes(in_size)                           # bias row (padded layout)
    return x_buf + o_buf + w_buf + b_buf + (2 << 20)               # + compiler slack


def _vmem_budget_bytes():
    """~75% of physical per-TC VMEM: ~48 MiB on v7x (64 MiB), ~96 MiB on v5e/v6e (128 MiB)."""
    try:
        cap = int(pltpu.get_tpu_info().vmem_capacity_bytes)
    except Exception:
        cap = 64 << 20  # conservative fallback (v7x-sized)
    return (cap * 3) // 4


def _choose_tile_n(N, in_size, out_pad, *, vmem_budget, w_buffers):
    """Fixed candidate set; minimize padded-row writeback first, then prefer >=4
    grid steps (>=2 per TC on v7x), then the larger tile."""
    n8 = _round_up(max(N, 8), 8)
    candidates = [t for t in (1024, 512, 256, 128) if t <= n8]
    if n8 < 128 or not candidates:
        # Tiny problem: one exact sublane-rounded tile -> zero padded-row writes.
        candidates = [n8]
    fitting = [t for t in candidates
               if _vmem_estimate(t, in_size, out_pad, w_buffers=w_buffers) <= vmem_budget]
    candidates = fitting or [min(candidates)]

    def score(t):
        n_pad = _round_up(N, t)
        waste = n_pad - N                      # garbage rows written to HBM
        steps = n_pad // t
        return (waste, 0 if steps >= 4 else 1, -t)

    return min(candidates, key=score)


def prepare_params(weights, bias, *, in_size, out_size):
    """One-time parameter prep (outside the per-step path): fold the 1/in_size
    mean scale into W and bias, lay bias out as a [1, in_size] row, and pad W's
    output dim only when out_size >= 128 (write-amplification-aware policy)."""
    if out_size >= 128:
        out_pad = _round_up(out_size, 128)     # no-op when already 128-aligned
    else:
        out_pad = out_size                     # full-dim block is legal; avoid 4x write amp
    inv_in = 1.0 / float(in_size)
    w = (weights.reshape(in_size, out_size) * inv_in).astype(jnp.float32)
    if out_pad != out_size:
        w_pad = jnp.zeros((in_size, out_pad), jnp.float32).at[:, :out_size].set(w)
    else:
        w_pad = w
    bias_row = (bias.reshape(1, in_size) * inv_in).astype(jnp.float32)
    return w_pad, bias_row


def _resident_spec(shape, buffered_once):
    if buffered_once:
        # Constant index_map -> double-buffering is pure VMEM waste; keep one buffer.
        return pl.BlockSpec(shape, lambda i: (0, 0), pipeline_mode=pl.Buffered(1))
    return pl.BlockSpec(shape, lambda i: (0, 0))


# ----------------------------- wrapper -----------------------------------------


def nan_embed(x, w_prepped, bias_row, out_size, *, out_dtype=None):
    """x: [B, S, in_size] float32 (may contain NaN). Returns [B, S, out_size].

    out_dtype: optionally emit the output in a narrower dtype (e.g. jnp.bfloat16)
    to halve HBM writeback if the consumer accepts it; default preserves x.dtype.
    """
    B, S, in_size = x.shape
    out_pad = w_prepped.shape[1]
    N = B * S
    out_dtype = x.dtype if out_dtype is None else out_dtype

    budget = _vmem_budget_bytes()
    # Only drop double-buffering on the resident W/bias when W is actually large
    # (that is the term that would otherwise force tile_n down on v7x).
    w_vmem_bytes = _round_up(in_size, 8) * _lane_bytes(out_pad)
    resident_buffered_once = w_vmem_bytes > (4 << 20)
    w_buffers = 1 if resident_buffered_once else 2

    tile_n = _choose_tile_n(N, in_size, out_pad, vmem_budget=budget, w_buffers=w_buffers)
    N_pad = _round_up(N, tile_n)

    x2 = x.reshape(N, in_size)
    if N_pad != N:
        # Padded rows compute bias-only garbage (no NaNs) and are sliced away.
        x2 = jnp.pad(x2, ((0, N_pad - N), (0, 0)))

    est = _vmem_estimate(tile_n, in_size, out_pad, w_buffers=w_buffers)
    vmem_limit = int(min(budget, max(32 << 20, est)))

    out = pl.pallas_call(
        _nan_embed_kernel,
        out_shape=jax.ShapeDtypeStruct((N_pad, out_pad), out_dtype),
        grid_spec=pltpu.PrefetchScalarGridSpec(
            num_scalar_prefetch=0,
            grid=(N_pad // tile_n,),
            in_specs=[
                pl.BlockSpec((tile_n, in_size), lambda i: (i, 0)),          # x rows
                _resident_spec((in_size, out_pad), resident_buffered_once),  # W (resident)
                _resident_spec((1, in_size), resident_buffered_once),        # bias row
            ],
            out_specs=pl.BlockSpec((tile_n, out_pad), lambda i: (i, 0)),
        ),
        compiler_params=pltpu.CompilerParams(
            # Row axis is independent; on v7x switch to pltpu.CORE_PARALLEL if
            # profiling shows only one TensorCore busy.
            dimension_semantics=("parallel",),
            vmem_limit_bytes=vmem_limit,
        ),
    )(x2, w_prepped, bias_row)

    if N_pad != N or out_pad != out_size:
        out = out[:N, :out_size]
    return out.reshape(B, S, out_size)


# ----------------------------- reference ----------------------------------------


def nan_embed_reference(x, weights, bias):
    """Pure-JAX reference mirroring the PyTorch forward exactly."""
    mask = jnp.isnan(x)
    big = jnp.finfo(x.dtype).max
    xc = jnp.clip(jnp.where(mask, 0.0, x), -big, big)       # torch.nan_to_num
    out = xc[..., None] * weights[None, None, :, :] + bias[None, None, :, :]
    out = jnp.where(mask[..., None], 0.0, out)
    return out.mean(axis=2)


# ----------------------------- demo / check --------------------------------------


if __name__ == "__main__":
    B, S, in_size, out_size = 2, 8, 4, 32

    key = jax.random.PRNGKey(0)
    k_w, k_b, k_x, k_nan = jax.random.split(key, 4)

    # Parameter init matching ContinuousEmbedding.__init__:
    #   weights ~ N(0, 0.1), shape (1, in_size, out_size) -> stored as (in_size, out_size)
    #   bias    ~ U[0, 1),  shape (1, in_size, 1)        -> stored as (in_size, 1)
    weights = (0.1 * jax.random.normal(k_w, (in_size, out_size))).astype(jnp.float32)
    bias = jax.random.uniform(k_b, (in_size, 1), dtype=jnp.float32)

    # One-time parameter prep (fold mean scale, choose out padding, bias as a row).
    w_prepped, bias_row = prepare_params(weights, bias, in_size=in_size, out_size=out_size)

    # Input with some NaNs sprinkled in deterministically.
    x = jax.random.normal(k_x, (B, S, in_size), dtype=jnp.float32)
    nan_mask = jax.random.uniform(k_nan, (B, S, in_size)) < 0.25
    x = jnp.where(nan_mask, jnp.nan, x)

    emb = nan_embed(x, w_prepped, bias_row, out_size)
    emb = jax.block_until_ready(emb)

    ref = nan_embed_reference(x, weights, bias)
    assert emb.shape == (B, S, out_size), emb.shape
    assert jnp.allclose(emb, ref, atol=1e-5, rtol=1e-5), "mismatch vs reference"

    print("KERNEL_OK")
</pallas_src>

<mosaic_0001>
module attributes {stable_mosaic.version = 11 : i64} {
  func.func @_nan_embed_kernel(%arg0: i32, %arg1: memref<16x4xf32, #tpu.memory_space<vmem>>, %arg2: memref<4x32xf32, #tpu.memory_space<vmem>>, %arg3: memref<1x4xf32, #tpu.memory_space<vmem>>, %arg4: memref<16x32xf32, #tpu.memory_space<vmem>>) attributes {dimension_semantics = [#tpu.dimension_semantics<parallel>], iteration_bounds = array<i64: 1>, scalar_prefetch = 0 : i64, scratch_operands = 0 : i64, tpu.core_type = #tpu.core_type<tc>, window_params = [{transform_indices = @transform_0, window_bounds = array<i64: 16, 4>}, {pipeline_mode = #tpu.pipeline_mode<synchronous>, transform_indices = @transform_1, window_bounds = array<i64: 4, 32>}, {pipeline_mode = #tpu.pipeline_mode<synchronous>, transform_indices = @transform_2, window_bounds = array<i64: 1, 4>}, {transform_indices = @transform_3, window_bounds = array<i64: 16, 32>}]} {
    %c0 = arith.constant 0 : index
    %c0_0 = arith.constant 0 : index
    %0 = vector.load %arg1[%c0, %c0_0] : memref<16x4xf32, #tpu.memory_space<vmem>>, vector<16x4xf32>
    %1 = arith.cmpf one, %0, %0 : vector<16x4xf32>
    %cst = arith.constant 0.000000e+00 : f32
    %2 = vector.broadcast %cst : f32 to vector<16x4xf32>
    %3 = arith.select %1, %2, %0 : vector<16x4xi1>, vector<16x4xf32>
    %cst_1 = arith.constant -3.40282347E+38 : f32
    %cst_2 = arith.constant 3.40282347E+38 : f32
    %4 = vector.broadcast %cst_1 : f32 to vector<16x4xf32>
    %5 = arith.maximumf %4, %3 : vector<16x4xf32>
    %6 = vector.broadcast %cst_2 : f32 to vector<16x4xf32>
    %7 = arith.minimumf %6, %5 : vector<16x4xf32>
    %cst_3 = arith.constant 0.000000e+00 : f32
    %cst_4 = arith.constant 1.000000e+00 : f32
    %8 = vector.broadcast %cst_3 : f32 to vector<16x4xf32>
    %9 = vector.broadcast %cst_4 : f32 to vector<16x4xf32>
    %10 = arith.select %1, %8, %9 : vector<16x4xi1>, vector<16x4xf32>
    %c0_5 = arith.constant 0 : index
    %c0_6 = arith.constant 0 : index
    %11 = vector.load %arg2[%c0_5, %c0_6] : memref<4x32xf32, #tpu.memory_space<vmem>>, vector<4x32xf32>
    %cst_7 = arith.constant dense<0.000000e+00> : vector<16x32xf32>
    %12 = tpu.matmul %7, %11, %cst_7 {dimension_numbers = #tpu.dot_dimension_numbers<[1], [0], [0], [1], [0, 0, 1, 1], [], []>} : vector<16x4xf32>, vector<4x32xf32>, vector<16x32xf32> -> vector<16x32xf32>
    %c0_8 = arith.constant 0 : index
    %c0_9 = arith.constant 0 : index
    %13 = vector.load %arg3[%c0_8, %c0_9] : memref<1x4xf32, #tpu.memory_space<vmem>>, vector<1x4xf32>
    %14 = vector.broadcast %13 : vector<1x4xf32> to vector<16x4xf32>
    %15 = arith.mulf %10, %14 : vector<16x4xf32>
    %cst_10 = arith.constant dense<0.000000e+00> : vector<16xf32>
    %16 = vector.multi_reduction <add>, %15, %cst_10 [1] : vector<16x4xf32> to vector<16xf32>
    %17 = vector.shape_cast %16 : vector<16xf32> to vector<16x1xf32>
    %18 = vector.broadcast %17 : vector<16x1xf32> to vector<16x32xf32>
    %19 = arith.addf %12, %18 : vector<16x32xf32>
    %c0_11 = arith.constant 0 : index
    %c0_12 = arith.constant 0 : index
    %20 = vector.load %arg4[%c0_11, %c0_12] : memref<16x32xf32, #tpu.memory_space<vmem>>, vector<16x32xf32>
    tpu.vector_store %arg4[%c0_11, %c0_12], %19 {strides = array<i32>} : memref<16x32xf32, #tpu.memory_space<vmem>>, vector<16x32xf32>,
    return
  }
  func.func @transform_0(%arg0: i32) -> (i32, i32) {
    %c0_i32 = arith.constant 0 : i32
    %c0_i32_0 = arith.constant 0 : i32
    return %arg0, %c0_i32 : i32, i32
  }
  func.func @transform_1(%arg0: i32) -> (i32, i32) {
    %c0_i32 = arith.constant 0 : i32
    %c0_i32_0 = arith.constant 0 : i32
    %c0_i32_1 = arith.constant 0 : i32
    return %c0_i32, %c0_i32_0 : i32, i32
  }
  func.func @transform_2(%arg0: i32) -> (i32, i32) {
    %c0_i32 = arith.constant 0 : i32
    %c0_i32_0 = arith.constant 0 : i32
    %c0_i32_1 = arith.constant 0 : i32
    return %c0_i32, %c0_i32_0 : i32, i32
  }
  func.func @transform_3(%arg0: i32) -> (i32, i32) {
    %c0_i32 = arith.constant 0 : i32
    %c0_i32_0 = arith.constant 0 : i32
    return %arg0, %c0_i32 : i32, i32
  }
}

</mosaic_0001>

<bundles_post_ra>
// kernel: tpu_custom_call.1
= control target key start
LH: loop header
LB: loop body
LE: loop exit
PB: predicated region body
PF: predicated region fallthrough
CT: control target
= control target key end

     0   :  { %vm50_vm0 = vcmask 1043456   ;;  %vm37_vm2 = vcmask 31744   ;;  %s242_s0 = inlined_call_operand.vmem [shape: f32[16,4], index: 0, kind: input, shape index: {}]   ;;  %s243_s1 = inlined_call_operand.vmem [shape: f32[4,32], index: 1, kind: input, shape index: {}]   ;;  %s244_s2 = inlined_call_operand.vmem [shape: f32[1,4], index: 2, kind: input, shape index: {}]   ;;  %s245_s3 = inlined_call_operand.hbm [shape: f32[16,32], index: 3, kind: output, shape index: {}]  }
   0x1   :  { %v27_v0 = vld [vmem:[%s243_s1] sm:$0xf]  ;;  %v16_v2 = vld [vmem:[%s242_s0 + $0x8] sm:$0xff] }
   0x2   :  { %v15_v1 = vld [vmem:[%s242_s0] sm:$0xff]  ;;  %157 = vmatprep.subr.msk.mxu0 %vm50_vm0, %v27_v0  ;;  %vm18_vm3 = vcmp.ne.f32.partialorder %v16_v2, %v16_v2 }
   0x3   :  { %vm17_vm1 = vcmp.ne.f32.partialorder %v15_v1, %v15_v1  ;;  %v150_v3 = vld [vmem:[%s244_s2] ss:$0 sm:$0xff] }
   0x4   :  { %8 = vsyncpa [#allocation3], 0  ;;  %158 = vmatpush3.msk.msra.mxu0 %vm50_vm0, %v27_v0  ;;  %v19_v4 = vsel %vm17_vm1, 0.0, %v15_v1  ;;  %v20_v5 = vsel %vm18_vm3, 0.0, %v16_v2  ;;  %v190_v6 = vmov 1.0   ;;  %s191_s0 = smov [#allocation2]  }
   0x5   :  { %v25_v7 = vsel %vm17_vm1, 0.0, %v190_v6  ;;  %v26_v8 = vsel %vm18_vm3, 0.0, %v190_v6  ;;  %v148_v9 = vclamps-f32 %v19_v4, 3.4028235e+38  ;;  %v149_v10 = vclamps-f32 %v20_v5, 3.4028235e+38 }
   0x6   :  { %v35_v11 = vmul.f32 %v150_v3, %v25_v7  ;;  %v36_v12 = vmul.f32 %v150_v3, %v26_v8  ;;  %s137_s1 = sshll.u32 %s191_s0, 4  ;;  %vm129_vm4 = vcmask 261120   ;;  %s138_s1 = int_to_ptr.vmem [resolvable:$true] %s137_s1 }
   0x7   :  { %159 = vmatprep.mubr.msk.f32.mxu0 %vm37_vm2, %v148_v9  ;;  %s166_s2 = scalar_lea.vmem %s138_s1, 256  ;;  %p171_p1 = scmp.lt.s32.totalorder %s138_s1, %s138_s1 }
   0x8   :  { %v38_v13 = vsel %vm37_vm2, %v35_v11, 0.0  ;;  %160 = vmatmul.mubr.msk.f32.vlgmr.msra.gmra.mrb[0].mxu0 %vm37_vm2, %v149_v10  ;;  %v41_v14 = vsel %vm37_vm2, %v36_v12, 0.0  ;;  %p167_p0 = scmp.ne.s32.totalorder %s138_s1, %s166_s2  ;;  %p172_p2 = scmp.lt.s32.totalorder %s166_s2, %s166_s2 }
   0x9   :  { %39 = vadd.xlane.f32.xlu0 %v38_v13 }
   0xa   :  { %p173_p3 = por %p172_p2, %p171_p1 }
   0xc   :  { %p174_p4 = pnand %p173_p3, %p167_p0 }
   0xd   :  { %42 = vadd.xlane.f32.xlu0 %v41_v14 }
  0x96   :  { %v40_v15 = vpop.xlane.xlu0 %39 }
  0x9a   :  { %v43_v16 = vpop.xlane.xlu0 %42 }
  0xdb   :  { %v161_v17 = vpop.f32.mrb[0].mxu0 }
  0xdc   :  { %v126_v18 = vadd.f32 %v161_v17, %v43_v16  ;;  %v120_v19 = vpop.f32.mrb[1].mxu0 }
  0xdd   :  { %v121_v20 = vadd.f32 %v120_v19, %v40_v15 }
  0xde   :  { %131 = vst.msk [vmem:[#allocation2 + $0x8] sm:$0xff] %vm129_vm4, %v126_v18 }
  0xdf   :  { %130 = vst.msk [vmem:[#allocation2] sm:$0xff] %vm129_vm4, %v121_v20 }
  0xe0   :  { %177 = shalt.err (!%p174_p4)
}
  0xe1   :  { %s178_s22 = scalar_lea.hbm %s245_s3, 256 }
  0xe2   :  { %p179_p5 = scmp.ne.s32.totalorder %s245_s3, %s178_s22  ;;  %p182_p6 = scmp.lt.u32.totalorder %s178_s22, %s245_s3 }
  0xe4   :  { %p184_p7 = pnand %p182_p6, %p179_p5 }
  0xe6   :  { %187 = shalt.err (!%p184_p7)
}
  0xe7   :  { %s192_s27 = smov 128   ;;  %s193_s28 = smov 8  }
  0xe8   :  { %143 = dma.vmem_to_hbm [thread:$0]  %s138_s1, 256, %s245_s3, [#allocation3], %s192_s27, %s192_s27, %s193_s28  }
  0xe9   :  { %188 = dma.done.wait [#allocation3], 256  }
  0xea   :  { %189 = vsyncadd [#allocation3], 4294967040 }
  0xeb   :  { %147 = vsyncpa [#allocation3], 1 }

</bundles_post_ra>
